<compile_context>
chip_gen: v7x
topology: tpu7x:2x2x1
jax: 0.10.0
libtpu: 0.0.40
codegen_flags: <defaults>
</compile_context>

<pallas_src>
import jax
import jax.numpy as jnp
from jax.experimental import pallas as pl
from jax.experimental.pallas import tpu as pltpu

IN_DIM = 178
H_PAD = 128          # every hidden / output width padded to one lane tile
LAYER_DIMS = [(178, 89), (89, 44), (44, 22), (22, 10), (10, 5)]
N_LAYERS = len(LAYER_DIMS)
OUT_DIM = LAYER_DIMS[-1][1]


def _round_up(x, m):
    return (x + m - 1) // m * m


def mlp_kernel(x_ref, w1_ref, wrest_ref, b_ref, o_ref):
    # x_ref:     (bt, 178)     bf16  (unpadded feature axis; Mosaic pads K for the MXU)
    # w1_ref:    (178, 128)    bf16  zero-padded on the output axis
    # wrest_ref: (4, 128, 128) bf16  zero-padded
    # b_ref:     (5, 1, 128)   f32   zero-padded
    # o_ref:     (bt, 128)     bf16  (cols >= 5 hold sigmoid(0)=0.5; dropped by wrapper)
    h = jnp.dot(x_ref[...], w1_ref[...],
                preferred_element_type=jnp.float32) + b_ref[0]
    h = jnp.maximum(h, 0.0)
    for l in range(3):                                   # hidden layers 2..4 (ReLU)
        h = jnp.dot(h.astype(jnp.bfloat16), wrest_ref[l],
                    preferred_element_type=jnp.float32) + b_ref[l + 1]
        h = jnp.maximum(h, 0.0)
    h = jnp.dot(h.astype(jnp.bfloat16), wrest_ref[3],    # output layer (no ReLU)
                preferred_element_type=jnp.float32) + b_ref[4]
    o_ref[...] = jax.nn.sigmoid(h).astype(o_ref.dtype)   # f32 sigmoid, bf16 store


def pack_params(params):
    """params: list of (W, b) with W shaped (in, out), b shaped (1, out)."""
    fi0, fo0 = LAYER_DIMS[0]
    w1 = jnp.zeros((fi0, H_PAD), jnp.float32).at[:, :fo0].set(params[0][0])
    wrest = jnp.zeros((N_LAYERS - 1, H_PAD, H_PAD), jnp.float32)
    bpack = jnp.zeros((N_LAYERS, 1, H_PAD), jnp.float32)
    bpack = bpack.at[0, 0, :fo0].set(params[0][1].reshape(-1))
    for l in range(1, N_LAYERS):
        fi, fo = LAYER_DIMS[l]
        wrest = wrest.at[l - 1, :fi, :fo].set(params[l][0])
        bpack = bpack.at[l, 0, :fo].set(params[l][1].reshape(-1))
    return w1.astype(jnp.bfloat16), wrest.astype(jnp.bfloat16), bpack


def mymlp_forward(x, params, b_tile=1024):
    """x: (B, 178) float. Returns (B, 5) float32 sigmoid outputs."""
    B = x.shape[0]
    assert x.shape[1] == IN_DIM

    # Grid sizing: fewest tiles of <= b_tile rows that cover B, but force at
    # least 2 grid steps whenever there is enough batch to split (>= 2 real
    # rows per step) so the "parallel" axis feeds both v7x TensorCores.
    n_steps = max(pl.cdiv(B, b_tile), 2 if B >= 16 else 1)
    bt = _round_up(pl.cdiv(B, n_steps), 8)     # sublane-aligned batch tile
    b_pad = bt * n_steps                       # at most 7 + (bt per missing step) dead rows

    xb = x.astype(jnp.bfloat16)                # halve HBM read traffic
    if b_pad != B:                             # pad batch only when actually needed
        xb = jnp.pad(xb, ((0, b_pad - B), (0, 0)))
    w1, wrest, bpack = pack_params(params)

    out = pl.pallas_call(
        mlp_kernel,
        out_shape=jax.ShapeDtypeStruct((b_pad, H_PAD), jnp.bfloat16),
        grid=(n_steps,),
        in_specs=[
            pl.BlockSpec((bt, IN_DIM), lambda i: (i, 0)),                     # x: tiled over batch
            pl.BlockSpec((IN_DIM, H_PAD), lambda i: (0, 0)),                  # W1: VMEM-resident
            pl.BlockSpec((N_LAYERS - 1, H_PAD, H_PAD), lambda i: (0, 0, 0)),  # W2..W5
            pl.BlockSpec((N_LAYERS, 1, H_PAD), lambda i: (0, 0, 0)),          # biases
        ],
        out_specs=pl.BlockSpec((bt, H_PAD), lambda i: (i, 0)),
        compiler_params=pltpu.CompilerParams(
            dimension_semantics=("parallel",),   # shard batch tiles across TCs (v7x)
        ),
    )(xb, w1, wrest, bpack)
    return out[:B, :OUT_DIM].astype(jnp.float32)


def init_params(key):
    """Deterministic init mimicking PyTorch nn.Linear defaults (uniform +/- 1/sqrt(fan_in))."""
    params = []
    for (fan_in, fan_out) in LAYER_DIMS:
        key, kw, kb = jax.random.split(key, 3)
        bound = 1.0 / jnp.sqrt(jnp.float32(fan_in))
        # Stored as (in, out) so the kernel can do x @ W + b directly.
        w = jax.random.uniform(kw, (fan_in, fan_out), jnp.float32, -bound, bound)
        b = jax.random.uniform(kb, (1, fan_out), jnp.float32, -bound, bound)
        params.append((w, b))
    return params


def reference_forward_f32(x, params):
    h = x
    for i, (w, b) in enumerate(params):
        h = h @ w + b
        if i < len(params) - 1:
            h = jnp.maximum(h, 0.0)
    return jax.nn.sigmoid(h)


def reference_forward_bf16(x, params):
    # Same matmul numerics as the kernel: bf16 inputs, f32 accumulation/elementwise.
    h = x
    for i, (w, b) in enumerate(params):
        h = jnp.dot(h.astype(jnp.bfloat16), w.astype(jnp.bfloat16),
                    preferred_element_type=jnp.float32) + b
        if i < len(params) - 1:
            h = jnp.maximum(h, 0.0)
    return jax.nn.sigmoid(h)


if __name__ == "__main__":
    key = jax.random.PRNGKey(0)
    kx, kp = jax.random.split(key)
    params = init_params(kp)

    # B=8: single-step grid, no padding. B=40: 2-step grid + batch padding path.
    for B in (8, 40):
        kx, sub = jax.random.split(kx)
        x = jax.random.normal(sub, (B, IN_DIM), jnp.float32)

        out = jax.block_until_ready(mymlp_forward(x, params))
        assert out.shape == (B, OUT_DIM), out.shape

        ref_bf16 = reference_forward_bf16(x, params)
        ref_f32 = reference_forward_f32(x, params)
        # Kernel output is stored in bf16 (values in [0,1]); allow ~2 bf16 ulps.
        assert jnp.allclose(out, ref_bf16, atol=4e-3), "mismatch vs bf16-matched reference"
        assert jnp.allclose(out, ref_f32, atol=5e-2, rtol=5e-2), "mismatch vs f32 reference"

    print("KERNEL_OK")
</pallas_src>

<mosaic_0001>
module attributes {stable_mosaic.version = 11 : i64} {
  func.func @mlp_kernel(%arg0: i32, %arg1: memref<8x178xbf16, #tpu.memory_space<vmem>>, %arg2: memref<178x128xbf16, #tpu.memory_space<vmem>>, %arg3: memref<4x128x128xbf16, #tpu.memory_space<vmem>>, %arg4: memref<5x1x128xf32, #tpu.memory_space<vmem>>, %arg5: memref<8x128xbf16, #tpu.memory_space<vmem>>) attributes {dimension_semantics = [#tpu.dimension_semantics<parallel>], iteration_bounds = array<i64: 1>, scalar_prefetch = 0 : i64, scratch_operands = 0 : i64, tpu.core_type = #tpu.core_type<tc>, window_params = [{transform_indices = @transform_0, window_bounds = array<i64: 8, 178>}, {pipeline_mode = #tpu.pipeline_mode<synchronous>, transform_indices = @transform_1, window_bounds = array<i64: 178, 128>}, {pipeline_mode = #tpu.pipeline_mode<synchronous>, transform_indices = @transform_2, window_bounds = array<i64: 4, 128, 128>}, {pipeline_mode = #tpu.pipeline_mode<synchronous>, transform_indices = @transform_3, window_bounds = array<i64: 5, 1, 128>}, {transform_indices = @transform_4, window_bounds = array<i64: 8, 128>}]} {
    %c0 = arith.constant 0 : index
    %c0_0 = arith.constant 0 : index
    %0 = vector.load %arg1[%c0, %c0_0] : memref<8x178xbf16, #tpu.memory_space<vmem>>, vector<8x178xbf16>
    %c0_1 = arith.constant 0 : index
    %c0_2 = arith.constant 0 : index
    %1 = vector.load %arg2[%c0_1, %c0_2] : memref<178x128xbf16, #tpu.memory_space<vmem>>, vector<178x128xbf16>
    %cst = arith.constant dense<0.000000e+00> : vector<8x128xf32>
    %2 = tpu.matmul %0, %1, %cst {dimension_numbers = #tpu.dot_dimension_numbers<[1], [0], [0], [1], [0, 0, 1, 1], [], []>} : vector<8x178xbf16>, vector<178x128xbf16>, vector<8x128xf32> -> vector<8x128xf32>
    %c0_3 = arith.constant 0 : index
    %c0_4 = arith.constant 0 : index
    %c0_5 = arith.constant 0 : index
    %3 = vector.load %arg4[%c0_3, %c0_4, %c0_5] : memref<5x1x128xf32, #tpu.memory_space<vmem>>, vector<1x1x128xf32>
    %4 = vector.shape_cast %3 : vector<1x1x128xf32> to vector<1x128xf32>
    %5 = vector.broadcast %4 : vector<1x128xf32> to vector<8x128xf32>
    %6 = arith.addf %2, %5 : vector<8x128xf32>
    %cst_6 = arith.constant 0.000000e+00 : f32
    %7 = vector.broadcast %cst_6 : f32 to vector<8x128xf32>
    %8 = arith.maximumf %6, %7 : vector<8x128xf32>
    %9 = arith.truncf %8 : vector<8x128xf32> to vector<8x128xbf16>
    %c0_7 = arith.constant 0 : index
    %c0_8 = arith.constant 0 : index
    %c0_9 = arith.constant 0 : index
    %10 = vector.load %arg3[%c0_7, %c0_8, %c0_9] : memref<4x128x128xbf16, #tpu.memory_space<vmem>>, vector<1x128x128xbf16>
    %11 = vector.shape_cast %10 : vector<1x128x128xbf16> to vector<128x128xbf16>
    %cst_10 = arith.constant dense<0.000000e+00> : vector<8x128xf32>
    %12 = tpu.matmul %9, %11, %cst_10 {dimension_numbers = #tpu.dot_dimension_numbers<[1], [0], [0], [1], [0, 0, 1, 1], [], []>} : vector<8x128xbf16>, vector<128x128xbf16>, vector<8x128xf32> -> vector<8x128xf32>
    %c1 = arith.constant 1 : index
    %c0_11 = arith.constant 0 : index
    %c0_12 = arith.constant 0 : index
    %13 = vector.load %arg4[%c1, %c0_11, %c0_12] : memref<5x1x128xf32, #tpu.memory_space<vmem>>, vector<1x1x128xf32>
    %14 = vector.shape_cast %13 : vector<1x1x128xf32> to vector<1x128xf32>
    %15 = vector.broadcast %14 : vector<1x128xf32> to vector<8x128xf32>
    %16 = arith.addf %12, %15 : vector<8x128xf32>
    %cst_13 = arith.constant 0.000000e+00 : f32
    %17 = vector.broadcast %cst_13 : f32 to vector<8x128xf32>
    %18 = arith.maximumf %16, %17 : vector<8x128xf32>
    %19 = arith.truncf %18 : vector<8x128xf32> to vector<8x128xbf16>
    %c1_14 = arith.constant 1 : index
    %c0_15 = arith.constant 0 : index
    %c0_16 = arith.constant 0 : index
    %20 = vector.load %arg3[%c1_14, %c0_15, %c0_16] : memref<4x128x128xbf16, #tpu.memory_space<vmem>>, vector<1x128x128xbf16>
    %21 = vector.shape_cast %20 : vector<1x128x128xbf16> to vector<128x128xbf16>
    %cst_17 = arith.constant dense<0.000000e+00> : vector<8x128xf32>
    %22 = tpu.matmul %19, %21, %cst_17 {dimension_numbers = #tpu.dot_dimension_numbers<[1], [0], [0], [1], [0, 0, 1, 1], [], []>} : vector<8x128xbf16>, vector<128x128xbf16>, vector<8x128xf32> -> vector<8x128xf32>
    %c2 = arith.constant 2 : index
    %c0_18 = arith.constant 0 : index
    %c0_19 = arith.constant 0 : index
    %23 = vector.load %arg4[%c2, %c0_18, %c0_19] : memref<5x1x128xf32, #tpu.memory_space<vmem>>, vector<1x1x128xf32>
    %24 = vector.shape_cast %23 : vector<1x1x128xf32> to vector<1x128xf32>
    %25 = vector.broadcast %24 : vector<1x128xf32> to vector<8x128xf32>
    %26 = arith.addf %22, %25 : vector<8x128xf32>
    %cst_20 = arith.constant 0.000000e+00 : f32
    %27 = vector.broadcast %cst_20 : f32 to vector<8x128xf32>
    %28 = arith.maximumf %26, %27 : vector<8x128xf32>
    %29 = arith.truncf %28 : vector<8x128xf32> to vector<8x128xbf16>
    %c2_21 = arith.constant 2 : index
    %c0_22 = arith.constant 0 : index
    %c0_23 = arith.constant 0 : index
    %30 = vector.load %arg3[%c2_21, %c0_22, %c0_23] : memref<4x128x128xbf16, #tpu.memory_space<vmem>>, vector<1x128x128xbf16>
    %31 = vector.shape_cast %30 : vector<1x128x128xbf16> to vector<128x128xbf16>
    %cst_24 = arith.constant dense<0.000000e+00> : vector<8x128xf32>
    %32 = tpu.matmul %29, %31, %cst_24 {dimension_numbers = #tpu.dot_dimension_numbers<[1], [0], [0], [1], [0, 0, 1, 1], [], []>} : vector<8x128xbf16>, vector<128x128xbf16>, vector<8x128xf32> -> vector<8x128xf32>
    %c3 = arith.constant 3 : index
    %c0_25 = arith.constant 0 : index
    %c0_26 = arith.constant 0 : index
    %33 = vector.load %arg4[%c3, %c0_25, %c0_26] : memref<5x1x128xf32, #tpu.memory_space<vmem>>, vector<1x1x128xf32>
    %34 = vector.shape_cast %33 : vector<1x1x128xf32> to vector<1x128xf32>
    %35 = vector.broadcast %34 : vector<1x128xf32> to vector<8x128xf32>
    %36 = arith.addf %32, %35 : vector<8x128xf32>
    %cst_27 = arith.constant 0.000000e+00 : f32
    %37 = vector.broadcast %cst_27 : f32 to vector<8x128xf32>
    %38 = arith.maximumf %36, %37 : vector<8x128xf32>
    %39 = arith.truncf %38 : vector<8x128xf32> to vector<8x128xbf16>
    %c3_28 = arith.constant 3 : index
    %c0_29 = arith.constant 0 : index
    %c0_30 = arith.constant 0 : index
    %40 = vector.load %arg3[%c3_28, %c0_29, %c0_30] : memref<4x128x128xbf16, #tpu.memory_space<vmem>>, vector<1x128x128xbf16>
    %41 = vector.shape_cast %40 : vector<1x128x128xbf16> to vector<128x128xbf16>
    %cst_31 = arith.constant dense<0.000000e+00> : vector<8x128xf32>
    %42 = tpu.matmul %39, %41, %cst_31 {dimension_numbers = #tpu.dot_dimension_numbers<[1], [0], [0], [1], [0, 0, 1, 1], [], []>} : vector<8x128xbf16>, vector<128x128xbf16>, vector<8x128xf32> -> vector<8x128xf32>
    %c4 = arith.constant 4 : index
    %c0_32 = arith.constant 0 : index
    %c0_33 = arith.constant 0 : index
    %43 = vector.load %arg4[%c4, %c0_32, %c0_33] : memref<5x1x128xf32, #tpu.memory_space<vmem>>, vector<1x1x128xf32>
    %44 = vector.shape_cast %43 : vector<1x1x128xf32> to vector<1x128xf32>
    %45 = vector.broadcast %44 : vector<1x128xf32> to vector<8x128xf32>
    %46 = arith.addf %42, %45 : vector<8x128xf32>
    %47 = arith.negf %46 : vector<8x128xf32>
    %48 = math.exp %47 : vector<8x128xf32>
    %cst_34 = arith.constant 1.000000e+00 : f32
    %49 = vector.broadcast %cst_34 : f32 to vector<8x128xf32>
    %50 = arith.addf %49, %48 : vector<8x128xf32>
    %51 = arith.divf %49, %50 : vector<8x128xf32>
    %52 = arith.truncf %51 : vector<8x128xf32> to vector<8x128xbf16>
    %c0_35 = arith.constant 0 : index
    %c0_36 = arith.constant 0 : index
    %53 = vector.load %arg5[%c0_35, %c0_36] : memref<8x128xbf16, #tpu.memory_space<vmem>>, vector<8x128xbf16>
    tpu.vector_store %arg5[%c0_35, %c0_36], %52 {strides = array<i32>} : memref<8x128xbf16, #tpu.memory_space<vmem>>, vector<8x128xbf16>,
    return
  }
  func.func @transform_0(%arg0: i32) -> (i32, i32) {
    %c0_i32 = arith.constant 0 : i32
    %c0_i32_0 = arith.constant 0 : i32
    return %arg0, %c0_i32 : i32, i32
  }
  func.func @transform_1(%arg0: i32) -> (i32, i32) {
    %c0_i32 = arith.constant 0 : i32
    %c0_i32_0 = arith.constant 0 : i32
    %c0_i32_1 = arith.constant 0 : i32
    return %c0_i32, %c0_i32_0 : i32, i32
  }
  func.func @transform_2(%arg0: i32) -> (i32, i32, i32) {
    %c0_i32 = arith.constant 0 : i32
    %c0_i32_0 = arith.constant 0 : i32
    %c0_i32_1 = arith.constant 0 : i32
    %c0_i32_2 = arith.constant 0 : i32
    return %c0_i32, %c0_i32_0, %c0_i32_1 : i32, i32, i32
  }
  func.func @transform_3(%arg0: i32) -> (i32, i32, i32) {
    %c0_i32 = arith.constant 0 : i32
    %c0_i32_0 = arith.constant 0 : i32
    %c0_i32_1 = arith.constant 0 : i32
    %c0_i32_2 = arith.constant 0 : i32
    return %c0_i32, %c0_i32_0, %c0_i32_1 : i32, i32, i32
  }
  func.func @transform_4(%arg0: i32) -> (i32, i32) {
    %c0_i32 = arith.constant 0 : i32
    %c0_i32_0 = arith.constant 0 : i32
    return %arg0, %c0_i32 : i32, i32
  }
}

</mosaic_0001>

<bundles_post_ra>
// kernel: tpu_custom_call.1
= control target key start
LH: loop header
LB: loop body
LE: loop exit
PB: predicated region body
PF: predicated region fallthrough
CT: control target
= control target key end

     0   :  { %9 = vsyncpa [#allocation3], 0  ;;  %s1164_s0 = inlined_call_operand.hbm [shape: bf16[8,178], index: 0, kind: input, shape index: {}]   ;;  %s1165_s1 = inlined_call_operand.hbm [shape: bf16[178,128], index: 1, kind: input, shape index: {}]   ;;  %s1166_s2 = inlined_call_operand.hbm [shape: bf16[4,128,128], index: 2, kind: input, shape index: {}]   ;;  %s1167_s3 = inlined_call_operand.vmem [shape: f32[5,1,128], index: 3, kind: input, shape index: {}]   ;;  %s1168_s4 = inlined_call_operand.hbm [shape: bf16[8,128], index: 4, kind: output, shape index: {}]  }
   0x1   :  { %10 = vsyncpa [#allocation6], 0 }
   0x2   :  { %11 = vsyncpa [#allocation4], 0  ;;  %s1021_s15 = smov [#allocation5]   ;;  %s927_s19 = scalar_lea.hbm %s1165_s1, 1472 }
   0x3   :  { %s27_s16 = sshll.u32 %s1021_s15, 4  ;;  %p928_p0 = scmp.ne.s32.totalorder %s1165_s1, %s927_s19  ;;  %s28_s16 = int_to_ptr.vmem [resolvable:$true] %s27_s16 }
   0x4   :  { %p931_p1 = scmp.lt.u32.totalorder %s927_s19, %s1165_s1 }
   0x6   :  { %p933_p2 = pnand %p931_p1, %p928_p0 }
   0x8   :  { %936 = shalt.err (!%p933_p2)
}
   0x9   :  { %s937_s24 = scalar_lea.vmem %s28_s16, 1472  ;;  %p942_p4 = scmp.lt.s32.totalorder %s28_s16, %s28_s16 }
   0xa   :  { %p938_p3 = scmp.ne.s32.totalorder %s28_s16, %s937_s24  ;;  %p943_p5 = scmp.lt.s32.totalorder %s937_s24, %s937_s24 }
   0xc   :  { %p944_p6 = por %p943_p5, %p942_p4 }
   0xe   :  { %p945_p7 = pnand %p944_p6, %p938_p3 }
  0x10   :  { %948 = shalt.err (!%p945_p7)
}
  0x11   :  { %s1022_s25 = smov 64   ;;  %s1023_s26 = smov 4  }
  0x12   :  { %33 = dma.hbm_to_vmem [thread:$0]  %s1165_s1, 1472, %s28_s16, [#allocation6], %s1022_s25, %s1022_s25, %s1023_s26  }
  0x13   :  { %s1024_s29 = smov [#allocation2]   ;;  %s1025_s5 = smov [#allocation7]  }
  0x14   :  { %s18_s30 = sshll.u32 %s1024_s29, 4  ;;  %s39_s6 = sshll.u32 %s1025_s5, 4  ;;  %s19_s30 = int_to_ptr.vmem [resolvable:$true] %s18_s30  ;;  %s40_s6 = int_to_ptr.vmem [resolvable:$true] %s39_s6 }
  0x15   :  { %s949_s9 = scalar_lea.hbm %s1164_s0, 128 }
  0x16   :  { %p950_p8 = scmp.ne.s32.totalorder %s1164_s0, %s949_s9  ;;  %p953_p9 = scmp.lt.u32.totalorder %s949_s9, %s1164_s0 }
  0x18   :  { %p955_p10 = pnand %p953_p9, %p950_p8 }
  0x1a   :  { %958 = shalt.err (!%p955_p10)
}
  0x1b   :  { %s959_s1 = scalar_lea.vmem %s19_s30, 128  ;;  %p964_p12 = scmp.lt.s32.totalorder %s19_s30, %s19_s30 }
  0x1c   :  { %p960_p11 = scmp.ne.s32.totalorder %s19_s30, %s959_s1  ;;  %p965_p13 = scmp.lt.s32.totalorder %s959_s1, %s959_s1 }
  0x1e   :  { %p966_p0 = por %p965_p13, %p964_p12 }
  0x20   :  { %p967_p1 = pnand %p966_p0, %p960_p11 }
  0x22   :  { %970 = shalt.err (!%p967_p1)
}
  0x23   :  { %21 = dma.hbm_to_vmem [thread:$0]  %s1164_s0, 128, %s19_s30, [#allocation3]  }
  0x24   :  { %s971_s18 = scalar_lea.hbm %s1166_s2, 4096 }
  0x25   :  { %p972_p2 = scmp.ne.s32.totalorder %s1166_s2, %s971_s18  ;;  %p975_p3 = scmp.lt.u32.totalorder %s971_s18, %s1166_s2 }
  0x27   :  { %p977_p4 = pnand %p975_p3, %p972_p2 }
  0x29   :  { %980 = shalt.err (!%p977_p4)
}
  0x2a   :  { %s981_s23 = scalar_lea.vmem %s40_s6, 4096  ;;  %p986_p6 = scmp.lt.s32.totalorder %s40_s6, %s40_s6 }
  0x2b   :  { %p982_p5 = scmp.ne.s32.totalorder %s40_s6, %s981_s23  ;;  %p987_p7 = scmp.lt.s32.totalorder %s981_s23, %s981_s23 }
  0x2d   :  { %p988_p8 = por %p987_p7, %p986_p6 }
  0x2f   :  { %p989_p9 = pnand %p988_p8, %p982_p5 }
  0x31   :  { %992 = shalt.err (!%p989_p9)
}
  0x32   :  { %45 = dma.hbm_to_vmem [thread:$0]  %s1166_s2, 4096, %s40_s6, [#allocation6], %s1022_s25, %s1022_s25, %s1023_s26  }
  0x33   :  { %1015 = dma.done.wait [#allocation3], 128  }
  0x34   :  { %1016 = vsyncadd [#allocation3], 4294967168 }
  0x35   :  { %1017 = dma.done.wait [#allocation6], 5568  }
  0x36   :  { %1018 = vsyncadd [#allocation6], 4294961728  ;;  %v1026_v0 = vmov 0   ;;  %v1027_v1 = vmov 0.0   ;;  %v877_v2 = vld [vmem:[#allocation5] sm:$0xff]   ;;  %v878_v3 = vld [vmem:[#allocation5 + $0x8] sm:$0xff]  }
  0x37   :  { %172 = vmatprep.subr.bf16.mxu0 %v1026_v0  ;;  %788 = vmatprep.subr.bf16.mxu1 %v1027_v1  ;;  %v879_v4 = vld [vmem:[#allocation5 + $0x10] sm:$0xff]   ;;  %v880_v5 = vld [vmem:[#allocation5 + $0x18] sm:$0xff]   ;;  %vm164_vm0 = vcmask 408576   ;;  %v881_v9 = vld [vmem:[#allocation5 + $0x20] sm:$0xff]   ;;  %vm168_vm1 = vcmask 1040384   ;;  %vm1028_vm2 = vmmov 0  }
  0x38   :  { %173 = vmatpush1.bf16.msra.mxu0 %v877_v2  ;;  %v58_v6 = vld [vmem:[#allocation2] sm:$0xff]  ;;  %v892_v10 = vld [vmem:[#allocation7 + $0x8] sm:$0xff]   ;;  %v893_v12 = vld [vmem:[#allocation7 + $0x10] sm:$0xff]   ;;  %804 = vmatprep.mubr.msk.bf16.mxu1 %vm1028_vm2, %v1027_v1  ;;  %s1029_s8 = smov [#allocation8]  }
  0x39   :  { %174 = vmatprep.subr.bf16.mxu0 %v1026_v0  ;;  %v697_v7 = vcombine.high %v58_v6, %v58_v6  ;;  %v891_v8 = vld [vmem:[#allocation7] sm:$0xff]   ;;  %v882_v11 = vld [vmem:[#allocation5 + $0x28] sm:$0xff]   ;;  %v883_v13 = vld [vmem:[#allocation5 + $0x30] sm:$0xff]   ;;  %v696_v23 = vcombine.low %v58_v6, %v58_v6  ;;  %s685_s9 = sshll.u32 %s1029_s8, 4  ;;  %s686_s9 = int_to_ptr.vmem [resolvable:$true] %s685_s9 }
  0x3a   :  { %789 = vmatpush3.bf16.msra.mxu1 %v891_v8  ;;  %v894_v14 = vld [vmem:[#allocation7 + $0x18] sm:$0xff]   ;;  %v895_v16 = vld [vmem:[#allocation7 + $0x20] sm:$0xff]   ;;  %v896_v18 = vld [vmem:[#allocation7 + $0x28] sm:$0xff]   ;;  %s993_s10 = scalar_lea.vmem %s686_s9, 64  ;;  %p998_p11 = scmp.lt.s32.totalorder %s686_s9, %s686_s9 }
  0x3b   :  { %710 = vmatprep.mubr.msk.bf16.mxu0 %vm164_vm0, %v697_v7  ;;  %790 = vmatprep.subr.bf16.mxu1 %v1027_v1  ;;  %v884_v15 = vld [vmem:[#allocation5 + $0x38] sm:$0xff]   ;;  %v885_v17 = vld [vmem:[#allocation5 + $0x40] sm:$0xff]   ;;  %v886_v19 = vld [vmem:[#allocation5 + $0x48] sm:$0xff]   ;;  %p994_p10 = scmp.ne.s32.totalorder %s686_s9, %s993_s10  ;;  %p999_p12 = scmp.lt.s32.totalorder %s993_s10, %s993_s10 }
  0x3c   :  { %175 = vmatpush1.bf16.msra.mxu0 %v878_v3  ;;  %v887_v20 = vld [vmem:[#allocation5 + $0x50] sm:$0xff]   ;;  %v888_v21 = vld [vmem:[#allocation5 + $0x58] ss:$0 sps:$4 sm:$0x11]   ;;  %v899_v33 = vld [vmem:[#allocation7 + $0x40] sm:$0xff]  }
  0x3d   :  { %176 = vmatprep.subr.bf16.mxu0 %v1026_v0  ;;  %v170_v22 = vsel %vm168_vm1, %v888_v21, 0  ;;  %v897_v24 = vld [vmem:[#allocation7 + $0x30] sm:$0xff]   ;;  %v898_v25 = vld [vmem:[#allocation7 + $0x38] sm:$0xff]   ;;  %v900_v35 = vld [vmem:[#allocation7 + $0x48] sm:$0xff]   ;;  %p1000_p13 = por %p999_p12, %p998_p11 }
  0x3e   :  { %791 = vmatpush3.bf16.msra.mxu1 %v892_v10  ;;  %v695_v26 = vld [vmem:[%s1167_s3] ss:$0 sm:$0xff]  ;;  %v901_v36 = vld [vmem:[#allocation7 + $0x50] sm:$0xff]   ;;  %v903_v38 = vld [vmem:[#allocation7 + $0x60] sm:$0xff]  }
  0x3f   :  { %792 = vmatprep.subr.bf16.mxu1 %v1027_v1  ;;  %v902_v37 = vld [vmem:[#allocation7 + $0x58] sm:$0xff]   ;;  %v904_v39 = vld [vmem:[#allocation7 + $0x68] sm:$0xff]   ;;  %v905_v40 = vld [vmem:[#allocation7 + $0x70] sm:$0xff]   ;;  %p1001_p0 = pnand %p1000_p13, %p994_p10 }
  0x40   :  { %177 = vmatpush1.bf16.msra.mxu0 %v879_v4  ;;  %v906_v41 = vld [vmem:[#allocation7 + $0x78] sm:$0xff]   ;;  %v907_v42 = vld [vmem:[#allocation7 + $0x80] sm:$0xff]   ;;  %v908_v43 = vld [vmem:[#allocation7 + $0x88] sm:$0xff]  }
  0x41   :  { %178 = vmatprep.subr.bf16.mxu0 %v1026_v0  ;;  %v909_v44 = vld [vmem:[#allocation7 + $0x90] sm:$0xff]   ;;  %v910_v45 = vld [vmem:[#allocation7 + $0x98] sm:$0xff]   ;;  %v911_v46 = vld [vmem:[#allocation7 + $0xa0] sm:$0xff]  }
  0x42   :  { %793 = vmatpush3.bf16.msra.mxu1 %v893_v12  ;;  %v912_v47 = vld [vmem:[#allocation7 + $0xa8] sm:$0xff]   ;;  %v712_v48 = vld [vmem:[%s1167_s3 + $0x1] ss:$0 sm:$0xff]  ;;  %v913_v56 = vld [vmem:[#allocation7 + $0xb0] sm:$0xff]  }
  0x43   :  { %794 = vmatprep.subr.bf16.mxu1 %v1027_v1  ;;  %v914_v57 = vld [vmem:[#allocation7 + $0xb8] sm:$0xff]   ;;  %v915_v58 = vld [vmem:[#allocation7 + $0xc0] sm:$0xff]   ;;  %v916_v59 = vld [vmem:[#allocation7 + $0xc8] sm:$0xff]  }
  0x44   :  { %179 = vmatpush1.bf16.msra.mxu0 %v880_v5  ;;  %v917_v60 = vld [vmem:[#allocation7 + $0xd0] sm:$0xff]   ;;  %v918_v61 = vld [vmem:[#allocation7 + $0xd8] sm:$0xff]   ;;  %v919_v62 = vld [vmem:[#allocation7 + $0xe0] sm:$0xff]  }
  0x45   :  { %180 = vmatprep.subr.bf16.mxu0 %v1026_v0  ;;  %v920_v63 = vld [vmem:[#allocation7 + $0xe8] sm:$0xff]   ;;  %v922_v10 = vld [vmem:[#allocation7 + $0xf8] sm:$0xff]  }
  0x46   :  { %795 = vmatpush3.bf16.msra.mxu1 %v894_v14 }
  0x47   :  { %796 = vmatprep.subr.bf16.mxu1 %v1027_v1 }
  0x48   :  { %181 = vmatpush1.bf16.msra.mxu0 %v881_v9  ;;  %v921_v9 = vld [vmem:[#allocation7 + $0xf0] sm:$0xff]  }
  0x49   :  { %182 = vmatprep.subr.bf16.mxu0 %v1026_v0 }
  0x4a   :  { %797 = vmatpush3.bf16.msra.mxu1 %v895_v16 }
  0x4b   :  { %798 = vmatprep.subr.bf16.mxu1 %v1027_v1 }
  0x4c   :  { %183 = vmatpush1.bf16.msra.mxu0 %v882_v11  ;;  %v732_v11 = vld [vmem:[%s1167_s3 + $0x3] ss:$0 sm:$0xff] }
  0x4d   :  { %184 = vmatprep.subr.bf16.mxu0 %v1026_v0 }
  0x4e   :  { %799 = vmatpush3.bf16.msra.mxu1 %v896_v18 }
  0x4f   :  { %800 = vmatprep.subr.bf16.mxu1 %v1027_v1 }
  0x50   :  { %185 = vmatpush1.bf16.msra.mxu0 %v883_v13 }
  0x51   :  { %186 = vmatprep.subr.bf16.mxu0 %v1026_v0 }
  0x52   :  { %801 = vmatpush3.bf16.msra.mxu1 %v897_v24 }
  0x53   :  { %802 = vmatprep.subr.bf16.mxu1 %v1027_v1 }
  0x54   :  { %187 = vmatpush1.bf16.msra.mxu0 %v884_v15 }
  0x55   :  { %188 = vmatprep.subr.bf16.mxu0 %v1026_v0 }
  0x56   :  { %803 = vmatpush3.bf16.msra.mxu1 %v898_v25 }
  0x57   :  { %808 = vmatprep.subr.bf16.mxu1 %v1027_v1 }
  0x58   :  { %189 = vmatpush1.bf16.msra.mxu0 %v885_v17 }
  0x59   :  { %190 = vmatprep.subr.bf16.mxu0 %v1026_v0 }
  0x5c   :  { %191 = vmatpush1.bf16.msra.mxu0 %v886_v19  ;;  %v742_v19 = vld [vmem:[%s1167_s3 + $0x4] ss:$0 sm:$0xff] }
  0x5d   :  { %192 = vmatprep.subr.bf16.mxu0 %v1026_v0 }
  0x60   :  { %193 = vmatpush1.bf16.msra.mxu0 %v887_v20 }
  0x61   :  { %194 = vmatprep.subr.bf16.mxu0 %v1026_v0  ;;  %v722_v0 = vld [vmem:[%s1167_s3 + $0x2] ss:$0 sm:$0xff] }
  0x64   :  { %195 = vmatpush1.bf16.msra.mxu0 %v170_v22 }
  0x65   :  { %828 = vmatprep.subr.bf16.mxu0 %v1027_v1 }
  0x67   :  { %205 = vmatmul.mubr.bf16.vlgmr.msra.gmra.mrb[0].mxu0 %v696_v23 }
  0x68   :  { %844 = vmatprep.mubr.msk.bf16.mxu0 %vm1028_vm2, %v1027_v1  ;;  %829 = vmatpush3.bf16.msra.mxu0 %v907_v42 }
  0x69   :  { %830 = vmatprep.subr.bf16.mxu0 %v1027_v1 }
  0x6c   :  { %831 = vmatpush3.bf16.msra.mxu0 %v908_v43 }
  0x6d   :  { %832 = vmatprep.subr.bf16.mxu0 %v1027_v1 }
  0x70   :  { %833 = vmatpush3.bf16.msra.mxu0 %v909_v44 }
  0x71   :  { %834 = vmatprep.subr.bf16.mxu0 %v1027_v1 }
  0x74   :  { %835 = vmatpush3.bf16.msra.mxu0 %v910_v45 }
  0x75   :  { %836 = vmatprep.subr.bf16.mxu0 %v1027_v1 }
  0x78   :  { %837 = vmatpush3.bf16.msra.mxu0 %v911_v46 }
  0x79   :  { %838 = vmatprep.subr.bf16.mxu0 %v1027_v1 }
  0x7c   :  { %839 = vmatpush3.bf16.msra.mxu0 %v912_v47 }
  0x7d   :  { %840 = vmatprep.subr.bf16.mxu0 %v1027_v1 }
  0x80   :  { %841 = vmatpush3.bf16.msra.mxu0 %v913_v56 }
  0x81   :  { %842 = vmatprep.subr.bf16.mxu0 %v1027_v1 }
  0x84   :  { %843 = vmatpush3.bf16.msra.mxu0 %v914_v57 }
 0x13a   :  { %v206_v27 = vpop.f32.mrb[0].mxu0 }
 0x13b   :  { %v207_v28 = vadd.f32 %v695_v26, %v206_v27  ;;  %v208_v29 = vpop.f32.mrb[1].mxu0 }
 0x13c   :  { %v209_v30 = vpop.f32.mrb[2].mxu0 }
 0x13d   :  { %v212_v31 = vmax.f32 %v207_v28, 0.0  ;;  %v210_v32 = vpop.f32.mrb[3].mxu0 }
 0x13f   :  { %v213_v34 = vpack.c.bf16 %v212_v31, %v212_v31 }
 0x141   :  { %805 = vmatmul.mubr.bf16.vlgmr.msra.gmra.mrb[0].mxu1 %v213_v34 }
 0x142   :  { %809 = vmatpush3.bf16.msra.mxu1 %v899_v33  ;;  %824 = vmatprep.mubr.msk.bf16.mxu1 %vm1028_vm2, %v1027_v1 }
 0x143   :  { %810 = vmatprep.subr.bf16.mxu1 %v1027_v1 }
 0x146   :  { %811 = vmatpush3.bf16.msra.mxu1 %v900_v35 }
 0x147   :  { %812 = vmatprep.subr.bf16.mxu1 %v1027_v1 }
 0x14a   :  { %813 = vmatpush3.bf16.msra.mxu1 %v901_v36 }
 0x14b   :  { %814 = vmatprep.subr.bf16.mxu1 %v1027_v1 }
 0x14e   :  { %815 = vmatpush3.bf16.msra.mxu1 %v902_v37 }
 0x14f   :  { %816 = vmatprep.subr.bf16.mxu1 %v1027_v1 }
 0x152   :  { %817 = vmatpush3.bf16.msra.mxu1 %v903_v38 }
 0x153   :  { %818 = vmatprep.subr.bf16.mxu1 %v1027_v1 }
 0x156   :  { %819 = vmatpush3.bf16.msra.mxu1 %v904_v39 }
 0x157   :  { %820 = vmatprep.subr.bf16.mxu1 %v1027_v1 }
 0x15a   :  { %821 = vmatpush3.bf16.msra.mxu1 %v905_v40 }
 0x15b   :  { %822 = vmatprep.subr.bf16.mxu1 %v1027_v1 }
 0x15e   :  { %823 = vmatpush3.bf16.msra.mxu1 %v906_v41 }
 0x15f   :  { %848 = vmatprep.subr.bf16.mxu1 %v1027_v1 }
 0x214   :  { %v320_v49 = vpop.f32.mrb[0].mxu1 }
 0x215   :  { %v321_v50 = vadd.f32 %v712_v48, %v320_v49  ;;  %v806_v51 = vpop.f32.mrb[1].mxu1 }
 0x216   :  { %v323_v52 = vpop.f32.mrb[2].mxu1 }
 0x217   :  { %v326_v53 = vmax.f32 %v321_v50, 0.0  ;;  %v807_v54 = vpop.f32.mrb[3].mxu1 }
 0x219   :  { %v327_v55 = vpack.c.bf16 %v326_v53, %v326_v53 }
 0x21b   :  { %825 = vmatmul.mubr.bf16.vlgmr.msra.gmra.mrb[4].mxu1 %v327_v55 }
 0x21c   :  { %864 = vmatprep.mubr.msk.bf16.mxu1 %vm1028_vm2, %v1027_v1  ;;  %849 = vmatpush3.bf16.msra.mxu1 %v915_v58 }
 0x21d   :  { %850 = vmatprep.subr.bf16.mxu1 %v1027_v1 }
 0x220   :  { %851 = vmatpush3.bf16.msra.mxu1 %v916_v59 }
 0x221   :  { %852 = vmatprep.subr.bf16.mxu1 %v1027_v1 }
 0x224   :  { %853 = vmatpush3.bf16.msra.mxu1 %v917_v60 }
 0x225   :  { %854 = vmatprep.subr.bf16.mxu1 %v1027_v1 }
 0x228   :  { %855 = vmatpush3.bf16.msra.mxu1 %v918_v61 }
 0x229   :  { %856 = vmatprep.subr.bf16.mxu1 %v1027_v1 }
 0x22c   :  { %857 = vmatpush3.bf16.msra.mxu1 %v919_v62 }
 0x22d   :  { %858 = vmatprep.subr.bf16.mxu1 %v1027_v1 }
 0x230   :  { %859 = vmatpush3.bf16.msra.mxu1 %v920_v63 }
 0x231   :  { %860 = vmatprep.subr.bf16.mxu1 %v1027_v1 }
 0x234   :  { %861 = vmatpush3.bf16.msra.mxu1 %v921_v9 }
 0x235   :  { %862 = vmatprep.subr.bf16.mxu1 %v1027_v1 }
 0x238   :  { %863 = vmatpush3.bf16.msra.mxu1 %v922_v10 }
 0x2ee   :  { %v435_v2 = vpop.f32.mrb[4].mxu1 }
 0x2ef   :  { %v436_v3 = vadd.f32 %v722_v0, %v435_v2  ;;  %v826_v4 = vpop.f32.mrb[5].mxu1 }
 0x2f0   :  { %v438_v5 = vpop.f32.mrb[6].mxu1 }
 0x2f1   :  { %v441_v6 = vmax.f32 %v436_v3, 0.0  ;;  %v827_v7 = vpop.f32.mrb[7].mxu1 }
 0x2f3   :  { %v442_v8 = vpack.c.bf16 %v441_v6, %v441_v6 }
 0x2f5   :  { %845 = vmatmul.mubr.bf16.vlgmr.msra.gmra.mrb[4].mxu0 %v442_v8 }
 0x3c8   :  { %v550_v12 = vpop.f32.mrb[4].mxu0 }
 0x3c9   :  { %v551_v13 = vadd.f32 %v732_v11, %v550_v12  ;;  %v846_v14 = vpop.f32.mrb[5].mxu0 }
 0x3ca   :  { %v553_v15 = vpop.f32.mrb[6].mxu0 }
 0x3cb   :  { %v556_v16 = vmax.f32 %v551_v13, 0.0  ;;  %v847_v17 = vpop.f32.mrb[7].mxu0 }
 0x3cd   :  { %v557_v18 = vpack.c.bf16 %v556_v16, %v556_v16 }
 0x3cf   :  { %865 = vmatmul.mubr.bf16.vlgmr.msra.gmra.mrb[8].mxu1 %v557_v18 }
 0x4a2   :  { %v665_v20 = vpop.f32.mrb[8].mxu1 }
 0x4a3   :  { %v666_v1 = vadd.f32 %v742_v19, %v665_v20  ;;  %v866_v21 = vpop.f32.mrb[9].mxu1 }
 0x4a4   :  { %v668_v22 = vpop.f32.mrb[10].mxu1 }
 0x4a5   :  { %v751_v23 = vmul.f32 -1.442695, %v666_v1  ;;  %v867_v24 = vpop.f32.mrb[11].mxu1 }
 0x4a7   :  { %923 = vpow2.f32 %v751_v23 }
 0x4b1   :  { %v924_v25 = vpop.eup %923 }
 0x4b2   :  { %v674_v26 = vadd.f32 1.0, %v924_v25 }
 0x4b4   :  { %925 = vrcp.f32 %v674_v26 }
 0x4be   :  { %v926_v27 = vpop.eup %925 }
 0x4bf   :  { %v677_v28 = vpack.c.bf16 %v926_v27, %v926_v27 }
 0x4c1   :  { %678 = vst [vmem:[#allocation8] sm:$0xf] %v677_v28 }
 0x4c2   :  { %1004 = shalt.err (!%p1001_p0)
}
 0x4c3   :  { %s1005_s12 = scalar_lea.hbm %s1168_s4, 64 }
 0x4c4   :  { %p1006_p1 = scmp.ne.s32.totalorder %s1168_s4, %s1005_s12  ;;  %p1009_p2 = scmp.lt.u32.totalorder %s1005_s12, %s1168_s4 }
 0x4c6   :  { %p1011_p3 = pnand %p1009_p2, %p1006_p1 }
 0x4c8   :  { %1014 = shalt.err (!%p1011_p3)
}
 0x4c9   :  { %688 = dma.vmem_to_hbm [thread:$0]  %s686_s9, 64, %s1168_s4, [#allocation4]  }
 0x4ca   :  { %1019 = dma.done.wait [#allocation4], 64  }
 0x4cb   :  { %1020 = vsyncadd [#allocation4], 4294967232 }
 0x4cc   :  { %692 = vsyncpa [#allocation3], 1 }
 0x4cd   :  { %693 = vsyncpa [#allocation6], 1 }
 0x4ce   :  { %694 = vsyncpa [#allocation4], 1 }

</bundles_post_ra>
